<compile_context>
chip_gen: v7x
topology: tpu7x:2x2x1
jax: 0.10.0
libtpu: 0.0.40
codegen_flags: <defaults>
</compile_context>

<pallas_src>
import numpy as np
import jax
import jax.numpy as jnp
from jax.experimental import pallas as pl
from jax.experimental.pallas import tpu as pltpu

IN_CH = 4
C1 = 8          # backbone stage-1 channels ('aux' feature)
C2 = 16         # backbone stage-2 channels ('out' feature)
NUM_CLASSES = 6
K_ALIGN = 8     # pad contraction dims to a multiple of 8 (f32 sublane tile)


def _round_up(x, m):
    return (x + m - 1) // m * m


def _cost(flops, nbytes):
    return pl.CostEstimate(flops=int(flops), transcendentals=0,
                           bytes_accessed=int(nbytes))


def _full_spec(a):
    # Whole-operand VMEM block, revisited (same block) every grid step.
    return pl.BlockSpec(a.shape, lambda i, nd=a.ndim: (0,) * nd)


# --------------------------------------------------------------------------
# Pallas kernels (one sample per grid step; all dots f32 with f32 accumulate).
# --------------------------------------------------------------------------
def _stage1_aux_kernel(p_ref, w1_ref, b1_ref, wa_ref, ba_ref, ra_ref,
                       f_ref, aux_ref):
    # stage-1 conv (as matmul on im2col patches) + ReLU
    p = p_ref[0]                                                # [K1P, S1]
    f = jnp.dot(w1_ref[...], p, preferred_element_type=jnp.float32)
    f = jnp.maximum(f + b1_ref[...], 0.0)                       # [C1, S1]
    f_ref[0] = f
    # aux 1x1 head + fused bilinear resize to input resolution (lane-dense HW)
    aux = jnp.dot(wa_ref[...], f,
                  preferred_element_type=jnp.float32) + ba_ref[...]
    aux_ref[0] = jnp.dot(aux, ra_ref[...],
                         preferred_element_type=jnp.float32)    # [NC, HW]


def _stage2_classifier_kernel(p_ref, w2_ref, b2_ref, wc1_ref, t3_ref,
                              bc1_ref, wc2_ref, bc2_ref, ro_ref, out_ref):
    # stage-2 conv (matmul on im2col patches) + ReLU; feature stays in-kernel
    p = p_ref[0]                                                # [K2P, S2]
    f2 = jnp.dot(w2_ref[...], p, preferred_element_type=jnp.float32)
    f2 = jnp.maximum(f2 + b2_ref[...], 0.0)                     # [C2, S2]
    # classifier 3x3 / stride-1 / pad-1 conv: 9 unrolled taps; the spatial
    # shift+zero-pad per tap is a constant [S2, S2] selection matrix (MXU),
    # avoiding any in-kernel pad/reshape relayouts.
    acc = jnp.zeros(f2.shape, jnp.float32)
    for t in range(9):                                          # static unroll
        tapped = jnp.dot(wc1_ref[t], f2, preferred_element_type=jnp.float32)
        acc = acc + jnp.dot(tapped, t3_ref[t],
                            preferred_element_type=jnp.float32)
    h = jnp.maximum(acc + bc1_ref[...], 0.0)                    # [C2, S2]
    # final 1x1 conv + fused bilinear resize (lane-dense HW output)
    logits = jnp.dot(wc2_ref[...], h,
                     preferred_element_type=jnp.float32) + bc2_ref[...]
    out_ref[0] = jnp.dot(logits, ro_ref[...],
                         preferred_element_type=jnp.float32)    # [NC, HW]


# --------------------------------------------------------------------------
# JAX/numpy glue: per-sample im2col, weight reshapes, bilinear & shift mats.
# --------------------------------------------------------------------------
def _im2col_nks(x, kh, kw, stride, pad, k_pad):
    """x: [N, C, H, W] -> patches [N, k_pad, OH*OW]; rows ordered (kh, kw, cin)."""
    n, c, h, w = x.shape
    xp = jnp.pad(x, ((0, 0), (0, 0), (pad, pad), (pad, pad)))
    oh = (h + 2 * pad - kh) // stride + 1
    ow = (w + 2 * pad - kw) // stride + 1
    taps = [xp[:, :, i:i + stride * oh:stride, j:j + stride * ow:stride]
            for i in range(kh) for j in range(kw)]
    p = jnp.stack(taps, axis=1).reshape(n, kh * kw * c, oh * ow)
    if k_pad > kh * kw * c:
        p = jnp.pad(p, ((0, 0), (0, k_pad - kh * kw * c), (0, 0)))
    return p.astype(jnp.float32), (oh, ow)


def _conv_weight_t(w_hwio, k_pad):
    """HWIO conv weight -> [cout, K_pad] matmul weight (cols = (kh,kw,cin))."""
    kh, kw, cin, cout = w_hwio.shape
    wt = w_hwio.reshape(kh * kw * cin, cout).T
    if k_pad > kh * kw * cin:
        wt = jnp.pad(wt, ((0, 0), (0, k_pad - kh * kw * cin)))
    return wt.astype(jnp.float32)


def _bias_col(b):
    return b.reshape(-1, 1).astype(jnp.float32)


def _bilinear_matrix(out_size, in_size):
    # Matches PyTorch F.interpolate(mode='bilinear', align_corners=False).
    scale = in_size / out_size
    dst = np.arange(out_size)
    src = np.maximum((dst + 0.5) * scale - 0.5, 0.0)
    i0 = np.minimum(np.floor(src).astype(np.int64), in_size - 1)
    i1 = np.minimum(i0 + 1, in_size - 1)
    w1 = src - i0
    w0 = 1.0 - w1
    mat = np.zeros((out_size, in_size), np.float32)
    mat[dst, i0] += w0
    mat[dst, i1] += w1
    return mat


def _bilinear_2d_t(out_h, out_w, in_h, in_w):
    """[in_h*in_w, out_h*out_w] operator; right-multiplies [C, in_h*in_w]."""
    m = np.kron(_bilinear_matrix(out_h, in_h), _bilinear_matrix(out_w, in_w))
    return np.ascontiguousarray(m.T)


def _shift_matrices_3x3(h, w):
    """T[t] (s x s): (f @ T[t])[c, p] = fpad[c, y+i, x+j] for p=(y,x), t=i*3+j,
    with zero padding of 1 and stride 1."""
    s = h * w
    t = np.zeros((9, s, s), np.float32)
    for idx in range(9):
        i, j = idx // 3, idx % 3
        for y in range(h):
            for x in range(w):
                yy, xx = y + i - 1, x + j - 1
                if 0 <= yy < h and 0 <= xx < w:
                    t[idx, yy * w + xx, y * w + x] = 1.0
    return t


# --------------------------------------------------------------------------
# Synthetic DeepLabV3: backbone / classifier / aux_classifier parameters.
# --------------------------------------------------------------------------
def init_params(key):
    ks = jax.random.split(key, 10)

    def w(k, shape):
        return jax.random.normal(k, shape, jnp.float32) * 0.1

    return {
        # backbone
        'b1_w': w(ks[0], (3, 3, IN_CH, C1)), 'b1_b': w(ks[1], (C1,)),
        'b2_w': w(ks[2], (3, 3, C1, C2)),    'b2_b': w(ks[3], (C2,)),
        # classifier head
        'c1_w': w(ks[4], (3, 3, C2, C2)),    'c1_b': w(ks[5], (C2,)),
        'c2_w': w(ks[6], (1, 1, C2, NUM_CLASSES)), 'c2_b': w(ks[7], (NUM_CLASSES,)),
        # aux classifier head
        'a1_w': w(ks[8], (1, 1, C1, NUM_CLASSES)), 'a1_b': w(ks[9], (NUM_CLASSES,)),
    }


def deeplabv3_forward(x_nchw, params):
    n, _, in_h, in_w = x_nchw.shape                 # input_shape = x.shape[-2:]
    hw = in_h * in_w

    # ---- call 1: backbone stage-1 (3x3/s2 conv+ReLU) + aux head + resize ---
    k1p = _round_up(3 * 3 * IN_CH, K_ALIGN)
    p1, (fa_h, fa_w) = _im2col_nks(x_nchw, 3, 3, 2, 1, k1p)
    s1 = fa_h * fa_w
    w1t = _conv_weight_t(params['b1_w'], k1p)                  # [C1, k1p]
    b1 = _bias_col(params['b1_b'])
    wat = _conv_weight_t(params['a1_w'], C1)                   # [NC, C1]
    ba = _bias_col(params['a1_b'])
    ra = jnp.asarray(_bilinear_2d_t(in_h, in_w, fa_h, fa_w))   # [s1, hw] f32

    f_aux, aux_up = pl.pallas_call(
        _stage1_aux_kernel,
        grid=(n,),
        out_shape=(jax.ShapeDtypeStruct((n, C1, s1), jnp.float32),
                   jax.ShapeDtypeStruct((n, NUM_CLASSES, hw), jnp.float32)),
        in_specs=[pl.BlockSpec((1, k1p, s1), lambda i: (i, 0, 0)),
                  _full_spec(w1t), _full_spec(b1),
                  _full_spec(wat), _full_spec(ba), _full_spec(ra)],
        out_specs=(pl.BlockSpec((1, C1, s1), lambda i: (i, 0, 0)),
                   pl.BlockSpec((1, NUM_CLASSES, hw), lambda i: (i, 0, 0))),
        compiler_params=pltpu.CompilerParams(
            dimension_semantics=("parallel",)),
        cost_estimate=_cost(
            n * (2 * C1 * k1p * s1 + 2 * NUM_CLASSES * C1 * s1
                 + 2 * NUM_CLASSES * s1 * hw),
            4 * (p1.size + w1t.size + b1.size + wat.size + ba.size + ra.size
                 + n * C1 * s1 + n * NUM_CLASSES * hw)),
    )(p1, w1t, b1, wat, ba, ra)

    # ---- call 2: stage-2 conv + classifier 3x3 + 1x1 head + resize ---------
    k2p = _round_up(3 * 3 * C1, K_ALIGN)
    f_img = f_aux.reshape(n, C1, fa_h, fa_w)
    p2, (fo_h, fo_w) = _im2col_nks(f_img, 3, 3, 2, 1, k2p)
    s2 = fo_h * fo_w
    w2t = _conv_weight_t(params['b2_w'], k2p)                  # [C2, k2p]
    b2 = _bias_col(params['b2_b'])
    # per-tap classifier weights [9, cout, cin] and spatial shift matrices
    wc1_taps = jnp.transpose(params['c1_w'].reshape(9, C2, C2),
                             (0, 2, 1)).astype(jnp.float32)
    t3 = jnp.asarray(_shift_matrices_3x3(fo_h, fo_w))          # [9, s2, s2]
    bc1 = _bias_col(params['c1_b'])
    wc2t = _conv_weight_t(params['c2_w'], C2)                  # [NC, C2]
    bc2 = _bias_col(params['c2_b'])
    ro = jnp.asarray(_bilinear_2d_t(in_h, in_w, fo_h, fo_w))   # [s2, hw] f32

    out_up = pl.pallas_call(
        _stage2_classifier_kernel,
        grid=(n,),
        out_shape=jax.ShapeDtypeStruct((n, NUM_CLASSES, hw), jnp.float32),
        in_specs=[pl.BlockSpec((1, k2p, s2), lambda i: (i, 0, 0)),
                  _full_spec(w2t), _full_spec(b2),
                  _full_spec(wc1_taps), _full_spec(t3),
                  _full_spec(bc1), _full_spec(wc2t), _full_spec(bc2),
                  _full_spec(ro)],
        out_specs=pl.BlockSpec((1, NUM_CLASSES, hw), lambda i: (i, 0, 0)),
        compiler_params=pltpu.CompilerParams(
            dimension_semantics=("parallel",)),
        cost_estimate=_cost(
            n * (2 * C2 * k2p * s2
                 + 9 * (2 * C2 * C2 * s2 + 2 * C2 * s2 * s2)
                 + 2 * NUM_CLASSES * C2 * s2 + 2 * NUM_CLASSES * s2 * hw),
            4 * (p2.size + w2t.size + b2.size + wc1_taps.size + t3.size
                 + bc1.size + wc2t.size + bc2.size + ro.size
                 + n * NUM_CLASSES * hw)),
    )(p2, w2t, b2, wc1_taps, t3, bc1, wc2t, bc2, ro)

    return {
        'out': out_up.reshape(n, NUM_CLASSES, in_h, in_w),
        'aux': aux_up.reshape(n, NUM_CLASSES, in_h, in_w),
    }


# --------------------------------------------------------------------------
# Pure-JAX reference (standard im2col for every conv) for a parity check.
# --------------------------------------------------------------------------
def _reference_forward(x, params):
    n, _, in_h, in_w = x.shape
    k1p = _round_up(3 * 3 * IN_CH, K_ALIGN)
    p1, (fa_h, fa_w) = _im2col_nks(x, 3, 3, 2, 1, k1p)
    f = jnp.maximum(jnp.einsum('ok,nks->nos', _conv_weight_t(params['b1_w'], k1p), p1)
                    + params['b1_b'][None, :, None], 0.0)
    aux = (jnp.einsum('oc,ncs->nos', _conv_weight_t(params['a1_w'], C1), f)
           + params['a1_b'][None, :, None])
    ra = jnp.asarray(_bilinear_2d_t(in_h, in_w, fa_h, fa_w))
    aux_up = jnp.einsum('nos,sh->noh', aux, ra).reshape(n, NUM_CLASSES, in_h, in_w)

    k2p = _round_up(3 * 3 * C1, K_ALIGN)
    p2, (fo_h, fo_w) = _im2col_nks(f.reshape(n, C1, fa_h, fa_w), 3, 3, 2, 1, k2p)
    f2 = jnp.maximum(jnp.einsum('ok,nks->nos', _conv_weight_t(params['b2_w'], k2p), p2)
                     + params['b2_b'][None, :, None], 0.0)
    k3 = 3 * 3 * C2
    p3, _ = _im2col_nks(f2.reshape(n, C2, fo_h, fo_w), 3, 3, 1, 1, k3)
    h = jnp.maximum(jnp.einsum('ok,nks->nos', _conv_weight_t(params['c1_w'], k3), p3)
                    + params['c1_b'][None, :, None], 0.0)
    logits = (jnp.einsum('oc,ncs->nos', _conv_weight_t(params['c2_w'], C2), h)
              + params['c2_b'][None, :, None])
    ro = jnp.asarray(_bilinear_2d_t(in_h, in_w, fo_h, fo_w))
    out_up = jnp.einsum('nos,sh->noh', logits, ro).reshape(n, NUM_CLASSES, in_h, in_w)
    return {'out': out_up, 'aux': aux_up}


if __name__ == "__main__":
    key = jax.random.PRNGKey(0)
    pkey, xkey = jax.random.split(key)
    params = init_params(pkey)
    x = jax.random.normal(xkey, (2, IN_CH, 16, 16), jnp.float32)

    fwd = jax.jit(deeplabv3_forward)
    out = fwd(x, params)
    jax.block_until_ready(out)

    assert out['out'].shape == (2, NUM_CLASSES, 16, 16), out['out'].shape
    assert out['aux'].shape == (2, NUM_CLASSES, 16, 16), out['aux'].shape
    assert bool(jnp.all(jnp.isfinite(out['out'])))
    assert bool(jnp.all(jnp.isfinite(out['aux'])))

    ref = _reference_forward(x, params)
    err_out = float(jnp.max(jnp.abs(out['out'] - ref['out'])))
    err_aux = float(jnp.max(jnp.abs(out['aux'] - ref['aux'])))
    assert err_out < 1e-3 and err_aux < 1e-3, (err_out, err_aux)

    print("KERNEL_OK")
</pallas_src>

<mosaic_0001>
module attributes {stable_mosaic.version = 11 : i64} {
  func.func @_stage1_aux_kernel(%arg0: i32, %arg1: memref<1x40x64xf32, #tpu.memory_space<vmem>>, %arg2: memref<8x40xf32, #tpu.memory_space<vmem>>, %arg3: memref<8x1xf32, #tpu.memory_space<vmem>>, %arg4: memref<6x8xf32, #tpu.memory_space<vmem>>, %arg5: memref<6x1xf32, #tpu.memory_space<vmem>>, %arg6: memref<64x256xf32, #tpu.memory_space<vmem>>, %arg7: memref<1x8x64xf32, #tpu.memory_space<vmem>>, %arg8: memref<1x6x256xf32, #tpu.memory_space<vmem>>) attributes {dimension_semantics = [#tpu.dimension_semantics<parallel>], iteration_bounds = array<i64: 2>, scalar_prefetch = 0 : i64, scratch_operands = 0 : i64, tpu.core_type = #tpu.core_type<tc>, window_params = [{transform_indices = @transform_0, window_bounds = array<i64: 1, 40, 64>}, {pipeline_mode = #tpu.pipeline_mode<synchronous>, transform_indices = @transform_1, window_bounds = array<i64: 8, 40>}, {pipeline_mode = #tpu.pipeline_mode<synchronous>, transform_indices = @transform_2, window_bounds = array<i64: 8, 1>}, {pipeline_mode = #tpu.pipeline_mode<synchronous>, transform_indices = @transform_3, window_bounds = array<i64: 6, 8>}, {pipeline_mode = #tpu.pipeline_mode<synchronous>, transform_indices = @transform_4, window_bounds = array<i64: 6, 1>}, {pipeline_mode = #tpu.pipeline_mode<synchronous>, transform_indices = @transform_5, window_bounds = array<i64: 64, 256>}, {transform_indices = @transform_6, window_bounds = array<i64: 1, 8, 64>}, {transform_indices = @transform_7, window_bounds = array<i64: 1, 6, 256>}]} {
    %c0 = arith.constant 0 : index
    %c0_0 = arith.constant 0 : index
    %c0_1 = arith.constant 0 : index
    %0 = vector.load %arg1[%c0, %c0_0, %c0_1] : memref<1x40x64xf32, #tpu.memory_space<vmem>>, vector<1x40x64xf32>
    %1 = vector.shape_cast %0 : vector<1x40x64xf32> to vector<40x64xf32>
    %c0_2 = arith.constant 0 : index
    %c0_3 = arith.constant 0 : index
    %2 = vector.load %arg2[%c0_2, %c0_3] : memref<8x40xf32, #tpu.memory_space<vmem>>, vector<8x40xf32>
    %cst = arith.constant dense<0.000000e+00> : vector<8x64xf32>
    %3 = tpu.matmul %2, %1, %cst {dimension_numbers = #tpu.dot_dimension_numbers<[1], [0], [0], [1], [0, 0, 1, 1], [], []>} : vector<8x40xf32>, vector<40x64xf32>, vector<8x64xf32> -> vector<8x64xf32>
    %c0_4 = arith.constant 0 : index
    %c0_5 = arith.constant 0 : index
    %4 = vector.load %arg3[%c0_4, %c0_5] : memref<8x1xf32, #tpu.memory_space<vmem>>, vector<8x1xf32>
    %5 = vector.broadcast %4 : vector<8x1xf32> to vector<8x64xf32>
    %6 = arith.addf %3, %5 : vector<8x64xf32>
    %cst_6 = arith.constant 0.000000e+00 : f32
    %7 = vector.broadcast %cst_6 : f32 to vector<8x64xf32>
    %8 = arith.maximumf %6, %7 : vector<8x64xf32>
    %c0_7 = arith.constant 0 : index
    %c0_8 = arith.constant 0 : index
    %c0_9 = arith.constant 0 : index
    %9 = vector.load %arg7[%c0_7, %c0_8, %c0_9] : memref<1x8x64xf32, #tpu.memory_space<vmem>>, vector<1x8x64xf32>
    %10 = vector.shape_cast %9 : vector<1x8x64xf32> to vector<8x64xf32>
    %11 = vector.shape_cast %8 : vector<8x64xf32> to vector<1x8x64xf32>
    tpu.vector_store %arg7[%c0_7, %c0_8, %c0_9], %11 {strides = array<i32>} : memref<1x8x64xf32, #tpu.memory_space<vmem>>, vector<1x8x64xf32>,
    %c0_10 = arith.constant 0 : index
    %c0_11 = arith.constant 0 : index
    %12 = vector.load %arg4[%c0_10, %c0_11] : memref<6x8xf32, #tpu.memory_space<vmem>>, vector<6x8xf32>
    %cst_12 = arith.constant dense<0.000000e+00> : vector<6x64xf32>
    %13 = tpu.matmul %12, %8, %cst_12 {dimension_numbers = #tpu.dot_dimension_numbers<[1], [0], [0], [1], [0, 0, 1, 1], [], []>} : vector<6x8xf32>, vector<8x64xf32>, vector<6x64xf32> -> vector<6x64xf32>
    %c0_13 = arith.constant 0 : index
    %c0_14 = arith.constant 0 : index
    %14 = vector.load %arg5[%c0_13, %c0_14] : memref<6x1xf32, #tpu.memory_space<vmem>>, vector<6x1xf32>
    %15 = vector.broadcast %14 : vector<6x1xf32> to vector<6x64xf32>
    %16 = arith.addf %13, %15 : vector<6x64xf32>
    %c0_15 = arith.constant 0 : index
    %c0_16 = arith.constant 0 : index
    %17 = vector.load %arg6[%c0_15, %c0_16] : memref<64x256xf32, #tpu.memory_space<vmem>>, vector<64x256xf32>
    %cst_17 = arith.constant dense<0.000000e+00> : vector<6x256xf32>
    %18 = tpu.matmul %16, %17, %cst_17 {dimension_numbers = #tpu.dot_dimension_numbers<[1], [0], [0], [1], [0, 0, 1, 1], [], []>} : vector<6x64xf32>, vector<64x256xf32>, vector<6x256xf32> -> vector<6x256xf32>
    %c0_18 = arith.constant 0 : index
    %c0_19 = arith.constant 0 : index
    %c0_20 = arith.constant 0 : index
    %19 = vector.load %arg8[%c0_18, %c0_19, %c0_20] : memref<1x6x256xf32, #tpu.memory_space<vmem>>, vector<1x6x256xf32>
    %20 = vector.shape_cast %19 : vector<1x6x256xf32> to vector<6x256xf32>
    %21 = vector.shape_cast %18 : vector<6x256xf32> to vector<1x6x256xf32>
    tpu.vector_store %arg8[%c0_18, %c0_19, %c0_20], %21 {strides = array<i32>} : memref<1x6x256xf32, #tpu.memory_space<vmem>>, vector<1x6x256xf32>,
    return
  }
  func.func @transform_0(%arg0: i32) -> (i32, i32, i32) {
    %c0_i32 = arith.constant 0 : i32
    %c0_i32_0 = arith.constant 0 : i32
    %c0_i32_1 = arith.constant 0 : i32
    return %arg0, %c0_i32, %c0_i32_0 : i32, i32, i32
  }
  func.func @transform_1(%arg0: i32) -> (i32, i32) {
    %c0_i32 = arith.constant 0 : i32
    %c0_i32_0 = arith.constant 0 : i32
    %c0_i32_1 = arith.constant 0 : i32
    return %c0_i32, %c0_i32_0 : i32, i32
  }
  func.func @transform_2(%arg0: i32) -> (i32, i32) {
    %c0_i32 = arith.constant 0 : i32
    %c0_i32_0 = arith.constant 0 : i32
    %c0_i32_1 = arith.constant 0 : i32
    return %c0_i32, %c0_i32_0 : i32, i32
  }
  func.func @transform_3(%arg0: i32) -> (i32, i32) {
    %c0_i32 = arith.constant 0 : i32
    %c0_i32_0 = arith.constant 0 : i32
    %c0_i32_1 = arith.constant 0 : i32
    return %c0_i32, %c0_i32_0 : i32, i32
  }
  func.func @transform_4(%arg0: i32) -> (i32, i32) {
    %c0_i32 = arith.constant 0 : i32
    %c0_i32_0 = arith.constant 0 : i32
    %c0_i32_1 = arith.constant 0 : i32
    return %c0_i32, %c0_i32_0 : i32, i32
  }
  func.func @transform_5(%arg0: i32) -> (i32, i32) {
    %c0_i32 = arith.constant 0 : i32
    %c0_i32_0 = arith.constant 0 : i32
    %c0_i32_1 = arith.constant 0 : i32
    return %c0_i32, %c0_i32_0 : i32, i32
  }
  func.func @transform_6(%arg0: i32) -> (i32, i32, i32) {
    %c0_i32 = arith.constant 0 : i32
    %c0_i32_0 = arith.constant 0 : i32
    %c0_i32_1 = arith.constant 0 : i32
    return %arg0, %c0_i32, %c0_i32_0 : i32, i32, i32
  }
  func.func @transform_7(%arg0: i32) -> (i32, i32, i32) {
    %c0_i32 = arith.constant 0 : i32
    %c0_i32_0 = arith.constant 0 : i32
    %c0_i32_1 = arith.constant 0 : i32
    return %arg0, %c0_i32, %c0_i32_0 : i32, i32, i32
  }
}

module attributes {stable_mosaic.version = 11 : i64} {
  func.func @_stage2_classifier_kernel(%arg0: i32, %arg1: memref<1x72x16xf32, #tpu.memory_space<vmem>>, %arg2: memref<16x72xf32, #tpu.memory_space<vmem>>, %arg3: memref<16x1xf32, #tpu.memory_space<vmem>>, %arg4: memref<9x16x16xf32, #tpu.memory_space<vmem>>, %arg5: memref<9x16x16xf32, #tpu.memory_space<vmem>>, %arg6: memref<16x1xf32, #tpu.memory_space<vmem>>, %arg7: memref<6x16xf32, #tpu.memory_space<vmem>>, %arg8: memref<6x1xf32, #tpu.memory_space<vmem>>, %arg9: memref<16x256xf32, #tpu.memory_space<vmem>>, %arg10: memref<1x6x256xf32, #tpu.memory_space<vmem>>) attributes {dimension_semantics = [#tpu.dimension_semantics<parallel>], iteration_bounds = array<i64: 2>, scalar_prefetch = 0 : i64, scratch_operands = 0 : i64, tpu.core_type = #tpu.core_type<tc>, window_params = [{transform_indices = @transform_0, window_bounds = array<i64: 1, 72, 16>}, {pipeline_mode = #tpu.pipeline_mode<synchronous>, transform_indices = @transform_1, window_bounds = array<i64: 16, 72>}, {pipeline_mode = #tpu.pipeline_mode<synchronous>, transform_indices = @transform_2, window_bounds = array<i64: 16, 1>}, {pipeline_mode = #tpu.pipeline_mode<synchronous>, transform_indices = @transform_3, window_bounds = array<i64: 9, 16, 16>}, {pipeline_mode = #tpu.pipeline_mode<synchronous>, transform_indices = @transform_4, window_bounds = array<i64: 9, 16, 16>}, {pipeline_mode = #tpu.pipeline_mode<synchronous>, transform_indices = @transform_5, window_bounds = array<i64: 16, 1>}, {pipeline_mode = #tpu.pipeline_mode<synchronous>, transform_indices = @transform_6, window_bounds = array<i64: 6, 16>}, {pipeline_mode = #tpu.pipeline_mode<synchronous>, transform_indices = @transform_7, window_bounds = array<i64: 6, 1>}, {pipeline_mode = #tpu.pipeline_mode<synchronous>, transform_indices = @transform_8, window_bounds = array<i64: 16, 256>}, {transform_indices = @transform_9, window_bounds = array<i64: 1, 6, 256>}]} {
    %c0 = arith.constant 0 : index
    %c0_0 = arith.constant 0 : index
    %c0_1 = arith.constant 0 : index
    %0 = vector.load %arg1[%c0, %c0_0, %c0_1] : memref<1x72x16xf32, #tpu.memory_space<vmem>>, vector<1x72x16xf32>
    %1 = vector.shape_cast %0 : vector<1x72x16xf32> to vector<72x16xf32>
    %c0_2 = arith.constant 0 : index
    %c0_3 = arith.constant 0 : index
    %2 = vector.load %arg2[%c0_2, %c0_3] : memref<16x72xf32, #tpu.memory_space<vmem>>, vector<16x72xf32>
    %cst = arith.constant dense<0.000000e+00> : vector<16x16xf32>
    %3 = tpu.matmul %2, %1, %cst {dimension_numbers = #tpu.dot_dimension_numbers<[1], [0], [0], [1], [0, 0, 1, 1], [], []>} : vector<16x72xf32>, vector<72x16xf32>, vector<16x16xf32> -> vector<16x16xf32>
    %c0_4 = arith.constant 0 : index
    %c0_5 = arith.constant 0 : index
    %4 = vector.load %arg3[%c0_4, %c0_5] : memref<16x1xf32, #tpu.memory_space<vmem>>, vector<16x1xf32>
    %5 = vector.broadcast %4 : vector<16x1xf32> to vector<16x16xf32>
    %6 = arith.addf %3, %5 : vector<16x16xf32>
    %cst_6 = arith.constant 0.000000e+00 : f32
    %7 = vector.broadcast %cst_6 : f32 to vector<16x16xf32>
    %8 = arith.maximumf %6, %7 : vector<16x16xf32>
    %cst_7 = arith.constant 0.000000e+00 : f32
    %9 = vector.broadcast %cst_7 : f32 to vector<16x16xf32>
    %c0_8 = arith.constant 0 : index
    %c0_9 = arith.constant 0 : index
    %c0_10 = arith.constant 0 : index
    %10 = vector.load %arg4[%c0_8, %c0_9, %c0_10] : memref<9x16x16xf32, #tpu.memory_space<vmem>>, vector<1x16x16xf32>
    %11 = vector.shape_cast %10 : vector<1x16x16xf32> to vector<16x16xf32>
    %cst_11 = arith.constant dense<0.000000e+00> : vector<16x16xf32>
    %12 = tpu.matmul %11, %8, %cst_11 {dimension_numbers = #tpu.dot_dimension_numbers<[1], [0], [0], [1], [0, 0, 1, 1], [], []>} : vector<16x16xf32>, vector<16x16xf32>, vector<16x16xf32> -> vector<16x16xf32>
    %c0_12 = arith.constant 0 : index
    %c0_13 = arith.constant 0 : index
    %c0_14 = arith.constant 0 : index
    %13 = vector.load %arg5[%c0_12, %c0_13, %c0_14] : memref<9x16x16xf32, #tpu.memory_space<vmem>>, vector<1x16x16xf32>
    %14 = vector.shape_cast %13 : vector<1x16x16xf32> to vector<16x16xf32>
    %cst_15 = arith.constant dense<0.000000e+00> : vector<16x16xf32>
    %15 = tpu.matmul %12, %14, %cst_15 {dimension_numbers = #tpu.dot_dimension_numbers<[1], [0], [0], [1], [0, 0, 1, 1], [], []>} : vector<16x16xf32>, vector<16x16xf32>, vector<16x16xf32> -> vector<16x16xf32>
    %16 = arith.addf %9, %15 : vector<16x16xf32>
    %c1 = arith.constant 1 : index
    %c0_16 = arith.constant 0 : index
    %c0_17 = arith.constant 0 : index
    %17 = vector.load %arg4[%c1, %c0_16, %c0_17] : memref<9x16x16xf32, #tpu.memory_space<vmem>>, vector<1x16x16xf32>
    %18 = vector.shape_cast %17 : vector<1x16x16xf32> to vector<16x16xf32>
    %cst_18 = arith.constant dense<0.000000e+00> : vector<16x16xf32>
    %19 = tpu.matmul %18, %8, %cst_18 {dimension_numbers = #tpu.dot_dimension_numbers<[1], [0], [0], [1], [0, 0, 1, 1], [], []>} : vector<16x16xf32>, vector<16x16xf32>, vector<16x16xf32> -> vector<16x16xf32>
    %c1_19 = arith.constant 1 : index
    %c0_20 = arith.constant 0 : index
    %c0_21 = arith.constant 0 : index
    %20 = vector.load %arg5[%c1_19, %c0_20, %c0_21] : memref<9x16x16xf32, #tpu.memory_space<vmem>>, vector<1x16x16xf32>
    %21 = vector.shape_cast %20 : vector<1x16x16xf32> to vector<16x16xf32>
    %cst_22 = arith.constant dense<0.000000e+00> : vector<16x16xf32>
    %22 = tpu.matmul %19, %21, %cst_22 {dimension_numbers = #tpu.dot_dimension_numbers<[1], [0], [0], [1], [0, 0, 1, 1], [], []>} : vector<16x16xf32>, vector<16x16xf32>, vector<16x16xf32> -> vector<16x16xf32>
    %23 = arith.addf %16, %22 : vector<16x16xf32>
    %c2 = arith.constant 2 : index
    %c0_23 = arith.constant 0 : index
    %c0_24 = arith.constant 0 : index
    %24 = vector.load %arg4[%c2, %c0_23, %c0_24] : memref<9x16x16xf32, #tpu.memory_space<vmem>>, vector<1x16x16xf32>
    %25 = vector.shape_cast %24 : vector<1x16x16xf32> to vector<16x16xf32>
    %cst_25 = arith.constant dense<0.000000e+00> : vector<16x16xf32>
    %26 = tpu.matmul %25, %8, %cst_25 {dimension_numbers = #tpu.dot_dimension_numbers<[1], [0], [0], [1], [0, 0, 1, 1], [], []>} : vector<16x16xf32>, vector<16x16xf32>, vector<16x16xf32> -> vector<16x16xf32>
    %c2_26 = arith.constant 2 : index
    %c0_27 = arith.constant 0 : index
    %c0_28 = arith.constant 0 : index
    %27 = vector.load %arg5[%c2_26, %c0_27, %c0_28] : memref<9x16x16xf32, #tpu.memory_space<vmem>>, vector<1x16x16xf32>
    %28 = vector.shape_cast %27 : vector<1x16x16xf32> to vector<16x16xf32>
    %cst_29 = arith.constant dense<0.000000e+00> : vector<16x16xf32>
    %29 = tpu.matmul %26, %28, %cst_29 {dimension_numbers = #tpu.dot_dimension_numbers<[1], [0], [0], [1], [0, 0, 1, 1], [], []>} : vector<16x16xf32>, vector<16x16xf32>, vector<16x16xf32> -> vector<16x16xf32>
    %30 = arith.addf %23, %29 : vector<16x16xf32>
    %c3 = arith.constant 3 : index
    %c0_30 = arith.constant 0 : index
    %c0_31 = arith.constant 0 : index
    %31 = vector.load %arg4[%c3, %c0_30, %c0_31] : memref<9x16x16xf32, #tpu.memory_space<vmem>>, vector<1x16x16xf32>
    %32 = vector.shape_cast %31 : vector<1x16x16xf32> to vector<16x16xf32>
    %cst_32 = arith.constant dense<0.000000e+00> : vector<16x16xf32>
    %33 = tpu.matmul %32, %8, %cst_32 {dimension_numbers = #tpu.dot_dimension_numbers<[1], [0], [0], [1], [0, 0, 1, 1], [], []>} : vector<16x16xf32>, vector<16x16xf32>, vector<16x16xf32> -> vector<16x16xf32>
    %c3_33 = arith.constant 3 : index
    %c0_34 = arith.constant 0 : index
    %c0_35 = arith.constant 0 : index
    %34 = vector.load %arg5[%c3_33, %c0_34, %c0_35] : memref<9x16x16xf32, #tpu.memory_space<vmem>>, vector<1x16x16xf32>
    %35 = vector.shape_cast %34 : vector<1x16x16xf32> to vector<16x16xf32>
    %cst_36 = arith.constant dense<0.000000e+00> : vector<16x16xf32>
    %36 = tpu.matmul %33, %35, %cst_36 {dimension_numbers = #tpu.dot_dimension_numbers<[1], [0], [0], [1], [0, 0, 1, 1], [], []>} : vector<16x16xf32>, vector<16x16xf32>, vector<16x16xf32> -> vector<16x16xf32>
    %37 = arith.addf %30, %36 : vector<16x16xf32>
    %c4 = arith.constant 4 : index
    %c0_37 = arith.constant 0 : index
    %c0_38 = arith.constant 0 : index
    %38 = vector.load %arg4[%c4, %c0_37, %c0_38] : memref<9x16x16xf32, #tpu.memory_space<vmem>>, vector<1x16x16xf32>
    %39 = vector.shape_cast %38 : vector<1x16x16xf32> to vector<16x16xf32>
    %cst_39 = arith.constant dense<0.000000e+00> : vector<16x16xf32>
    %40 = tpu.matmul %39, %8, %cst_39 {dimension_numbers = #tpu.dot_dimension_numbers<[1], [0], [0], [1], [0, 0, 1, 1], [], []>} : vector<16x16xf32>, vector<16x16xf32>, vector<16x16xf32> -> vector<16x16xf32>
    %c4_40 = arith.constant 4 : index
    %c0_41 = arith.constant 0 : index
    %c0_42 = arith.constant 0 : index
    %41 = vector.load %arg5[%c4_40, %c0_41, %c0_42] : memref<9x16x16xf32, #tpu.memory_space<vmem>>, vector<1x16x16xf32>
    %42 = vector.shape_cast %41 : vector<1x16x16xf32> to vector<16x16xf32>
    %cst_43 = arith.constant dense<0.000000e+00> : vector<16x16xf32>
    %43 = tpu.matmul %40, %42, %cst_43 {dimension_numbers = #tpu.dot_dimension_numbers<[1], [0], [0], [1], [0, 0, 1, 1], [], []>} : vector<16x16xf32>, vector<16x16xf32>, vector<16x16xf32> -> vector<16x16xf32>
    %44 = arith.addf %37, %43 : vector<16x16xf32>
    %c5 = arith.constant 5 : index
    %c0_44 = arith.constant 0 : index
    %c0_45 = arith.constant 0 : index
    %45 = vector.load %arg4[%c5, %c0_44, %c0_45] : memref<9x16x16xf32, #tpu.memory_space<vmem>>, vector<1x16x16xf32>
    %46 = vector.shape_cast %45 : vector<1x16x16xf32> to vector<16x16xf32>
    %cst_46 = arith.constant dense<0.000000e+00> : vector<16x16xf32>
    %47 = tpu.matmul %46, %8, %cst_46 {dimension_numbers = #tpu.dot_dimension_numbers<[1], [0], [0], [1], [0, 0, 1, 1], [], []>} : vector<16x16xf32>, vector<16x16xf32>, vector<16x16xf32> -> vector<16x16xf32>
    %c5_47 = arith.constant 5 : index
    %c0_48 = arith.constant 0 : index
    %c0_49 = arith.constant 0 : index
    %48 = vector.load %arg5[%c5_47, %c0_48, %c0_49] : memref<9x16x16xf32, #tpu.memory_space<vmem>>, vector<1x16x16xf32>
    %49 = vector.shape_cast %48 : vector<1x16x16xf32> to vector<16x16xf32>
    %cst_50 = arith.constant dense<0.000000e+00> : vector<16x16xf32>
    %50 = tpu.matmul %47, %49, %cst_50 {dimension_numbers = #tpu.dot_dimension_numbers<[1], [0], [0], [1], [0, 0, 1, 1], [], []>} : vector<16x16xf32>, vector<16x16xf32>, vector<16x16xf32> -> vector<16x16xf32>
    %51 = arith.addf %44, %50 : vector<16x16xf32>
    %c6 = arith.constant 6 : index
    %c0_51 = arith.constant 0 : index
    %c0_52 = arith.constant 0 : index
    %52 = vector.load %arg4[%c6, %c0_51, %c0_52] : memref<9x16x16xf32, #tpu.memory_space<vmem>>, vector<1x16x16xf32>
    %53 = vector.shape_cast %52 : vector<1x16x16xf32> to vector<16x16xf32>
    %cst_53 = arith.constant dense<0.000000e+00> : vector<16x16xf32>
    %54 = tpu.matmul %53, %8, %cst_53 {dimension_numbers = #tpu.dot_dimension_numbers<[1], [0], [0], [1], [0, 0, 1, 1], [], []>} : vector<16x16xf32>, vector<16x16xf32>, vector<16x16xf32> -> vector<16x16xf32>
    %c6_54 = arith.constant 6 : index
    %c0_55 = arith.constant 0 : index
    %c0_56 = arith.constant 0 : index
    %55 = vector.load %arg5[%c6_54, %c0_55, %c0_56] : memref<9x16x16xf32, #tpu.memory_space<vmem>>, vector<1x16x16xf32>
    %56 = vector.shape_cast %55 : vector<1x16x16xf32> to vector<16x16xf32>
    %cst_57 = arith.constant dense<0.000000e+00> : vector<16x16xf32>
    %57 = tpu.matmul %54, %56, %cst_57 {dimension_numbers = #tpu.dot_dimension_numbers<[1], [0], [0], [1], [0, 0, 1, 1], [], []>} : vector<16x16xf32>, vector<16x16xf32>, vector<16x16xf32> -> vector<16x16xf32>
    %58 = arith.addf %51, %57 : vector<16x16xf32>
    %c7 = arith.constant 7 : index
    %c0_58 = arith.constant 0 : index
    %c0_59 = arith.constant 0 : index
    %59 = vector.load %arg4[%c7, %c0_58, %c0_59] : memref<9x16x16xf32, #tpu.memory_space<vmem>>, vector<1x16x16xf32>
    %60 = vector.shape_cast %59 : vector<1x16x16xf32> to vector<16x16xf32>
    %cst_60 = arith.constant dense<0.000000e+00> : vector<16x16xf32>
    %61 = tpu.matmul %60, %8, %cst_60 {dimension_numbers = #tpu.dot_dimension_numbers<[1], [0], [0], [1], [0, 0, 1, 1], [], []>} : vector<16x16xf32>, vector<16x16xf32>, vector<16x16xf32> -> vector<16x16xf32>
    %c7_61 = arith.constant 7 : index
    %c0_62 = arith.constant 0 : index
    %c0_63 = arith.constant 0 : index
    %62 = vector.load %arg5[%c7_61, %c0_62, %c0_63] : memref<9x16x16xf32, #tpu.memory_space<vmem>>, vector<1x16x16xf32>
    %63 = vector.shape_cast %62 : vector<1x16x16xf32> to vector<16x16xf32>
    %cst_64 = arith.constant dense<0.000000e+00> : vector<16x16xf32>
    %64 = tpu.matmul %61, %63, %cst_64 {dimension_numbers = #tpu.dot_dimension_numbers<[1], [0], [0], [1], [0, 0, 1, 1], [], []>} : vector<16x16xf32>, vector<16x16xf32>, vector<16x16xf32> -> vector<16x16xf32>
    %65 = arith.addf %58, %64 : vector<16x16xf32>
    %c8 = arith.constant 8 : index
    %c0_65 = arith.constant 0 : index
    %c0_66 = arith.constant 0 : index
    %66 = vector.load %arg4[%c8, %c0_65, %c0_66] : memref<9x16x16xf32, #tpu.memory_space<vmem>>, vector<1x16x16xf32>
    %67 = vector.shape_cast %66 : vector<1x16x16xf32> to vector<16x16xf32>
    %cst_67 = arith.constant dense<0.000000e+00> : vector<16x16xf32>
    %68 = tpu.matmul %67, %8, %cst_67 {dimension_numbers = #tpu.dot_dimension_numbers<[1], [0], [0], [1], [0, 0, 1, 1], [], []>} : vector<16x16xf32>, vector<16x16xf32>, vector<16x16xf32> -> vector<16x16xf32>
    %c8_68 = arith.constant 8 : index
    %c0_69 = arith.constant 0 : index
    %c0_70 = arith.constant 0 : index
    %69 = vector.load %arg5[%c8_68, %c0_69, %c0_70] : memref<9x16x16xf32, #tpu.memory_space<vmem>>, vector<1x16x16xf32>
    %70 = vector.shape_cast %69 : vector<1x16x16xf32> to vector<16x16xf32>
    %cst_71 = arith.constant dense<0.000000e+00> : vector<16x16xf32>
    %71 = tpu.matmul %68, %70, %cst_71 {dimension_numbers = #tpu.dot_dimension_numbers<[1], [0], [0], [1], [0, 0, 1, 1], [], []>} : vector<16x16xf32>, vector<16x16xf32>, vector<16x16xf32> -> vector<16x16xf32>
    %72 = arith.addf %65, %71 : vector<16x16xf32>
    %c0_72 = arith.constant 0 : index
    %c0_73 = arith.constant 0 : index
    %73 = vector.load %arg6[%c0_72, %c0_73] : memref<16x1xf32, #tpu.memory_space<vmem>>, vector<16x1xf32>
    %74 = vector.broadcast %73 : vector<16x1xf32> to vector<16x16xf32>
    %75 = arith.addf %72, %74 : vector<16x16xf32>
    %cst_74 = arith.constant 0.000000e+00 : f32
    %76 = vector.broadcast %cst_74 : f32 to vector<16x16xf32>
    %77 = arith.maximumf %75, %76 : vector<16x16xf32>
    %c0_75 = arith.constant 0 : index
    %c0_76 = arith.constant 0 : index
    %78 = vector.load %arg7[%c0_75, %c0_76] : memref<6x16xf32, #tpu.memory_space<vmem>>, vector<6x16xf32>
    %cst_77 = arith.constant dense<0.000000e+00> : vector<6x16xf32>
    %79 = tpu.matmul %78, %77, %cst_77 {dimension_numbers = #tpu.dot_dimension_numbers<[1], [0], [0], [1], [0, 0, 1, 1], [], []>} : vector<6x16xf32>, vector<16x16xf32>, vector<6x16xf32> -> vector<6x16xf32>
    %c0_78 = arith.constant 0 : index
    %c0_79 = arith.constant 0 : index
    %80 = vector.load %arg8[%c0_78, %c0_79] : memref<6x1xf32, #tpu.memory_space<vmem>>, vector<6x1xf32>
    %81 = vector.broadcast %80 : vector<6x1xf32> to vector<6x16xf32>
    %82 = arith.addf %79, %81 : vector<6x16xf32>
    %c0_80 = arith.constant 0 : index
    %c0_81 = arith.constant 0 : index
    %83 = vector.load %arg9[%c0_80, %c0_81] : memref<16x256xf32, #tpu.memory_space<vmem>>, vector<16x256xf32>
    %cst_82 = arith.constant dense<0.000000e+00> : vector<6x256xf32>
    %84 = tpu.matmul %82, %83, %cst_82 {dimension_numbers = #tpu.dot_dimension_numbers<[1], [0], [0], [1], [0, 0, 1, 1], [], []>} : vector<6x16xf32>, vector<16x256xf32>, vector<6x256xf32> -> vector<6x256xf32>
    %c0_83 = arith.constant 0 : index
    %c0_84 = arith.constant 0 : index
    %c0_85 = arith.constant 0 : index
    %85 = vector.load %arg10[%c0_83, %c0_84, %c0_85] : memref<1x6x256xf32, #tpu.memory_space<vmem>>, vector<1x6x256xf32>
    %86 = vector.shape_cast %85 : vector<1x6x256xf32> to vector<6x256xf32>
    %87 = vector.shape_cast %84 : vector<6x256xf32> to vector<1x6x256xf32>
    tpu.vector_store %arg10[%c0_83, %c0_84, %c0_85], %87 {strides = array<i32>} : memref<1x6x256xf32, #tpu.memory_space<vmem>>, vector<1x6x256xf32>,
    return
  }
  func.func @transform_0(%arg0: i32) -> (i32, i32, i32) {
    %c0_i32 = arith.constant 0 : i32
    %c0_i32_0 = arith.constant 0 : i32
    %c0_i32_1 = arith.constant 0 : i32
    return %arg0, %c0_i32, %c0_i32_0 : i32, i32, i32
  }
  func.func @transform_1(%arg0: i32) -> (i32, i32) {
    %c0_i32 = arith.constant 0 : i32
    %c0_i32_0 = arith.constant 0 : i32
    %c0_i32_1 = arith.constant 0 : i32
    return %c0_i32, %c0_i32_0 : i32, i32
  }
  func.func @transform_2(%arg0: i32) -> (i32, i32) {
    %c0_i32 = arith.constant 0 : i32
    %c0_i32_0 = arith.constant 0 : i32
    %c0_i32_1 = arith.constant 0 : i32
    return %c0_i32, %c0_i32_0 : i32, i32
  }
  func.func @transform_3(%arg0: i32) -> (i32, i32, i32) {
    %c0_i32 = arith.constant 0 : i32
    %c0_i32_0 = arith.constant 0 : i32
    %c0_i32_1 = arith.constant 0 : i32
    %c0_i32_2 = arith.constant 0 : i32
    return %c0_i32, %c0_i32_0, %c0_i32_1 : i32, i32, i32
  }
  func.func @transform_4(%arg0: i32) -> (i32, i32, i32) {
    %c0_i32 = arith.constant 0 : i32
    %c0_i32_0 = arith.constant 0 : i32
    %c0_i32_1 = arith.constant 0 : i32
    %c0_i32_2 = arith.constant 0 : i32
    return %c0_i32, %c0_i32_0, %c0_i32_1 : i32, i32, i32
  }
  func.func @transform_5(%arg0: i32) -> (i32, i32) {
    %c0_i32 = arith.constant 0 : i32
    %c0_i32_0 = arith.constant 0 : i32
    %c0_i32_1 = arith.constant 0 : i32
    return %c0_i32, %c0_i32_0 : i32, i32
  }
  func.func @transform_6(%arg0: i32) -> (i32, i32) {
    %c0_i32 = arith.constant 0 : i32
    %c0_i32_0 = arith.constant 0 : i32
    %c0_i32_1 = arith.constant 0 : i32
    return %c0_i32, %c0_i32_0 : i32, i32
  }
  func.func @transform_7(%arg0: i32) -> (i32, i32) {
    %c0_i32 = arith.constant 0 : i32
    %c0_i32_0 = arith.constant 0 : i32
    %c0_i32_1 = arith.constant 0 : i32
    return %c0_i32, %c0_i32_0 : i32, i32
  }
  func.func @transform_8(%arg0: i32) -> (i32, i32) {
    %c0_i32 = arith.constant 0 : i32
    %c0_i32_0 = arith.constant 0 : i32
    %c0_i32_1 = arith.constant 0 : i32
    return %c0_i32, %c0_i32_0 : i32, i32
  }
  func.func @transform_9(%arg0: i32) -> (i32, i32, i32) {
    %c0_i32 = arith.constant 0 : i32
    %c0_i32_0 = arith.constant 0 : i32
    %c0_i32_1 = arith.constant 0 : i32
    return %arg0, %c0_i32, %c0_i32_0 : i32, i32, i32
  }
}

</mosaic_0001>

<bundles_post_ra>
// kernel: deeplabv3_forward.2
= control target key start
LH: loop header
LB: loop body
LE: loop exit
PB: predicated region body
PF: predicated region fallthrough
CT: control target
= control target key end

     0   :  { %s767_s24 = smov 0   ;;  %s854_s0 = inlined_call_operand.vmem [shape: f32[2,40,64], index: 0, kind: input, shape index: {}]   ;;  %s855_s1 = inlined_call_operand.vmem [shape: f32[8,40], index: 1, kind: input, shape index: {}]   ;;  %s856_s2 = inlined_call_operand.vmem [shape: f32[8,1], index: 2, kind: input, shape index: {}]   ;;  %s857_s3 = inlined_call_operand.vmem [shape: f32[6,8], index: 3, kind: input, shape index: {}]   ;;  %s858_s4 = inlined_call_operand.vmem [shape: f32[6,1], index: 4, kind: input, shape index: {}]   ;;  %s859_s5 = inlined_call_operand.vmem [shape: f32[64,256], index: 5, kind: input, shape index: {}]   ;;  %s860_s6 = inlined_call_operand.vmem [shape: f32[2,8,64], index: 6, kind: output, shape index: {0}]   ;;  %s861_s7 = inlined_call_operand.vmem [shape: f32[2,6,256], index: 7, kind: output, shape index: {1}]  }
   0x1 LB: > { %s638_s25 = sadd.s32 4294967295, %s721_s24   ;;  %p642_p0 = scmp.ge.s32.totalorder %s721_s24, 1  ;;  %s721_s24 = sphi %s767_s24, %s18_s24  }
   0x2   : > { %p240_p1 = scmp.lt.s32.totalorder %s721_s24, 3 }
   0x4   : > { %p241_p2 = pnand %p642_p0, %p240_p1 }
   0x5   : > { %p276_p3 = scmp.lt.s32.totalorder (!%p241_p2), %s638_s25, 1  ;;  %v723_v0 = vmov (!%p241_p2), 0.0|0.0   ;;  %vm724_vm0 = vmmov (!%p241_p2), 0   ;;  %v725_v1 = vmov (!%p241_p2), 0.0   ;;  %v296_v2 = vld [vmem:[%s856_s2] sm:$0xff] (!%p241_p2)  ;;  %v726_v3 = vmov (!%p241_p2), 0  }
   0x6   : > { %244 = sbr.rel (%p241_p2) target bundleno = 674 (0x2a2), region = 44  ;;  %679 = vmatprep.subr.bf16.mxu0 (!%p241_p2), %v723_v0  ;;  %671 = vmatprep.mubr.msk.f32.mxu0 (!%p241_p2), %vm724_vm0, %v725_v1  ;;  %v380_v4 = vld [vmem:[%s858_s4] sm:$0x3f] (!%p241_p2)  ;;  %vm302_vm1 = vcmask (!%p241_p2), 326656   ;;  %v461_v13 = vld [vmem:[%s859_s5 + $0x8] sm:$0xff] (!%p241_p2)  ;;  %v463_v14 = vld [vmem:[%s859_s5 + $0x18] sm:$0xff] (!%p241_p2) }
   0x7   : > { %714 = vset.pattern.permute.xlu0 (!%p241_p2), %v726_v3  ;;  %543 = vmatprep.mubr.f32.mxu1 (!%p241_p2), %v725_v1  ;;  %v295_v12 = vld [vmem:[%s855_s1] sm:$0xff] (!%p241_p2)  ;;  %v685_v16 = vpack.c.bf16 (!%p241_p2), %v463_v14, %v461_v13  ;;  %v462_v17 = vld [vmem:[%s859_s5 + $0x10] sm:$0xff] (!%p241_p2)  ;;  %v465_v18 = vld [vmem:[%s859_s5 + $0x28] sm:$0xff] (!%p241_p2)  ;;  %vm377_vm2 = vcmask (!%p241_p2), 523264   ;;  %vm386_vm3 = vcmask (!%p241_p2), 64512  }
   0x8   : > { %299 = vperm.xlu0 (!%p241_p2), %714, %v296_v2   ;;  %v460_v15 = vld [vmem:[%s859_s5] sm:$0xff] (!%p241_p2)  ;;  %v467_v19 = vld [vmem:[%s859_s5 + $0x38] sm:$0xff] (!%p241_p2)  ;;  %v466_v23 = vld [vmem:[%s859_s5 + $0x30] sm:$0xff] (!%p241_p2) }
   0x9   : > { %v687_v20 = vpack.c.bf16 (!%p241_p2), %v462_v17, %v460_v15  ;;  %v689_v21 = vpack.c.bf16 (!%p241_p2), %v467_v19, %v465_v18  ;;  %v464_v22 = vld [vmem:[%s859_s5 + $0x20] sm:$0xff] (!%p241_p2)  ;;  %v469_v24 = vld [vmem:[%s859_s5 + $0x48] sm:$0xff] (!%p241_p2)  ;;  %686 = vmatprep.subr.bf16.mxu1 (!%p241_p2), %v685_v16  ;;  %v471_v25 = vld [vmem:[%s859_s5 + $0x58] sm:$0xff] (!%p241_p2) }
   0xa   : > { %v691_v26 = vpack.c.bf16 (!%p241_p2), %v466_v23, %v464_v22  ;;  %v693_v27 = vpack.c.bf16 (!%p241_p2), %v471_v25, %v469_v24  ;;  %v468_v28 = vld [vmem:[%s859_s5 + $0x40] sm:$0xff] (!%p241_p2)  ;;  %v470_v29 = vld [vmem:[%s859_s5 + $0x50] sm:$0xff] (!%p241_p2)  ;;  %v473_v30 = vld [vmem:[%s859_s5 + $0x68] sm:$0xff] (!%p241_p2) }
   0xb   : > { %688 = vmatpush1.bf16.msra.mxu1 (!%p241_p2), %v687_v20  ;;  %v475_v31 = vld [vmem:[%s859_s5 + $0x78] sm:$0xff] (!%p241_p2)  ;;  %v695_v32 = vpack.c.bf16 (!%p241_p2), %v470_v29, %v468_v28  ;;  %v379_v39 = vld [vmem:[%s857_s3] sm:$0x3f] (!%p241_p2)  ;;  %v474_v41 = vld [vmem:[%s859_s5 + $0x70] sm:$0xff] (!%p241_p2) }
   0xc   : > { %383 = vperm.xlu0 (!%p241_p2), %714, %v380_v4   ;;  %690 = vmatprep.subr.bf16.mxu1 (!%p241_p2), %v689_v21  ;;  %v697_v33 = vpack.c.bf16 (!%p241_p2), %v475_v31, %v473_v30  ;;  %v472_v40 = vld [vmem:[%s859_s5 + $0x60] sm:$0xff] (!%p241_p2) }
   0xd   : > { %s863_s25 = smov (!%p276_p3, %s638_s25), 1  ;;  %v699_v42 = vpack.c.bf16 %v474_v41, %v472_v40 }
   0xe   : > { %s701_s28 = smul.u32 40, %s863_s25  ;;  %s644_s20 = sshll.u32 %s863_s25, 3 }
   0xf   : > { %692 = vmatpush1.bf16.msra.mxu1 %v691_v26  ;;  %s284_s23 = scalar_lea.vmem %s860_s6, %s644_s20  ;;  %s652_s9 = sshll.u32 %s863_s25, 4 }
  0x10   : > { %s280_s10 = scalar_lea.vmem %s854_s0, %s701_s28  ;;  %694 = vmatprep.subr.bf16.mxu1 %v693_v27  ;;  %s289_s12 = scalar_lea.vmem %s861_s7, %s652_s9 }
  0x11   : > { %v290_v5 = vld [vmem:[%s280_s10] sm:$0xff]  ;;  %v291_v6 = vld [vmem:[%s280_s10 + $0x8] sm:$0xff]  ;;  %v292_v7 = vld [vmem:[%s280_s10 + $0x10] sm:$0xff] }
  0x12   : > { %v680_v8 = vpack.c.bf16 %v291_v6, %v290_v5  ;;  %v293_v9 = vld [vmem:[%s280_s10 + $0x18] sm:$0xff]  ;;  %v294_v11 = vld [vmem:[%s280_s10 + $0x20] sm:$0xff] }
  0x13   : > { %v683_v10 = vpack.c.bf16 %v293_v9, %v292_v7  ;;  %696 = vmatpush1.bf16.msra.mxu1 %v695_v32 }
  0x14   : > { %681 = vmatpush3.bf16.msra.mxu0 %v680_v8  ;;  %698 = vmatprep.subr.bf16.mxu1 %v697_v33 }
  0x15   : > { %682 = vmatprep.subr.bf16.mxu0 %v723_v0 }
  0x17   : > { %700 = vmatpush1.bf16.msra.mxu1 %v699_v42 }
  0x18   : > { %684 = vmatpush3.bf16.msra.mxu0 %v683_v10 }
  0x19   : > { %669 = vmatprep.subr.mxu0 %v725_v1 }
  0x1c   : > { %670 = vmatpush3.msra.mxu0 %v294_v11 }
  0x1d   : > { %672 = vmatmul.mubr.msk.f32.vlgmr.msra.gmra.mrb[0].mxu0 %vm302_vm1, %v295_v12  ;;  %674 = vmatprep.subr.mxu0 %v725_v1 }
  0x1e   : > { %676 = vmatprep.mubr.msk.f32.mxu0 %vm724_vm0, %v725_v1 }
  0x87   : > { %v300_v34 = vpop.permute.xlu0 %299 }
  0x8b   : > { %v384_v43 = vpop.permute.xlu0 %383 }
  0xf0   : > { %v372_v35 = vpop.f32.mrb[0].mxu0 }
  0xf1   : > { %v373_v36 = vadd.f32 %v372_v35, %v300_v34  ;;  %v673_v37 = vpop.f32.mrb[1].mxu0 }
  0xf3   : > { %v376_v38 = vmax.f32 %v373_v36, 0.0 }
  0xf5   : > { %675 = vmatpush3.msra.mxu0 %v376_v38  ;;  %378 = vst.msk [vmem:[%s284_s23] sm:$0xff] %vm377_vm2, %v376_v38 }
  0xf6   : > { %677 = vmatmul.mubr.msk.f32.vlgmr.msra.gmra.mrb[2].mxu0 %vm386_vm3, %v379_v39 }
 0x1c9   : > { %v456_v44 = vpop.f32.mrb[2].mxu0 }
 0x1ca   : > { %v457_v45 = vadd.f32 %v456_v44, %v384_v43  ;;  %v678_v46 = vpop.f32.mrb[3].mxu0 }
 0x1cc   : > { %649 = vmatmul.mubr.msk.f32.vlgmr.msra.gmra.mrb[0].mxu1 %vm377_vm2, %v457_v45 }
 0x29f   : > { %v545_v47 = vpop.f32.mrb[0].mxu1 }
 0x2a0   : > { %550 = vst [vmem:[%s289_s12] sm:$0x3f] %v545_v47  ;;  %v547_v48 = vpop.f32.mrb[1].mxu1 }
 0x2a1   : > { %551 = vst [vmem:[%s289_s12 + $0x8] sm:$0x3f] %v547_v48 }
 0x2a2 PF: > { %s18_s24 = sadd.s32 1, %s721_s24  }
 0x2a3   : > { %p15_p4 = scmp.ge.s32.totalorder %s18_s24, 4  }
 0x2a5   :  { %17 = sbr.rel (!%p15_p4) target bundleno = 1 (0x1), region = 86 }

// kernel: deeplabv3_forward.3
= control target key start
LH: loop header
LB: loop body
LE: loop exit
PB: predicated region body
PF: predicated region fallthrough
CT: control target
= control target key end

     0   :  { %s2707_s30 = smov 0   ;;  %s2932_s0 = inlined_call_operand.vmem [shape: f32[2,72,16], index: 0, kind: input, shape index: {}]   ;;  %s2933_s1 = inlined_call_operand.vmem [shape: f32[16,72], index: 1, kind: input, shape index: {}]   ;;  %s2934_s2 = inlined_call_operand.vmem [shape: f32[16,1], index: 2, kind: input, shape index: {}]   ;;  %s2935_s3 = inlined_call_operand.vmem [shape: f32[9,16,16], index: 3, kind: input, shape index: {}]   ;;  %s2936_s4 = inlined_call_operand.vmem [shape: f32[9,16,16], index: 4, kind: input, shape index: {}]   ;;  %s2937_s5 = inlined_call_operand.vmem [shape: f32[16,1], index: 5, kind: input, shape index: {}]   ;;  %s2938_s6 = inlined_call_operand.vmem [shape: f32[6,16], index: 6, kind: input, shape index: {}]   ;;  %s2939_s7 = inlined_call_operand.vmem [shape: f32[6,1], index: 7, kind: input, shape index: {}]   ;;  %s2940_s8 = inlined_call_operand.vmem [shape: f32[16,256], index: 8, kind: input, shape index: {}]   ;;  %s2941_s9 = inlined_call_operand.vmem [shape: f32[2,6,256], index: 9, kind: output, shape index: {}]  }
   0x1 LB: > { %s2196_s10 = sadd.s32 4294967295, %s2651_s30   ;;  %p2200_p0 = scmp.ge.s32.totalorder %s2651_s30, 1  ;;  %s2651_s30 = sphi %s2707_s30, %s19_s30  }
   0x2   : > { %p287_p1 = scmp.lt.s32.totalorder %s2651_s30, 3 }
   0x4   : > { %p288_p2 = pnand %p2200_p0, %p287_p1 }
   0x5   : > { %p323_p3 = scmp.lt.s32.totalorder (!%p288_p2), %s2196_s10, 1  ;;  %v342_v0 = vld [vmem:[%s2933_s1] sm:$0xff] (!%p288_p2)  ;;  %vm356_vm0 = vcmask (!%p288_p2), 588800   ;;  %v2653_v2 = vmov (!%p288_p2), 0   ;;  %v345_v3 = vld [vmem:[%s2934_s2 + $0x8] sm:$0xff] (!%p288_p2)  ;;  %vm442_vm1 = vcmask (!%p288_p2), 130048  }
   0x6   : > { %291 = sbr.rel (%p288_p2) target bundleno = 1403 (0x57b), region = 56  ;;  %v344_v1 = vld [vmem:[%s2934_s2] sm:$0xff] (!%p288_p2)  ;;  %2383 = vmatprep.mubr.msk.f32.mxu0 (!%p288_p2), %vm356_vm0, %v342_v0  ;;  %2643 = vset.pattern.permute.xlu0 (!%p288_p2), %v2653_v2  ;;  %v343_v18 = vld [vmem:[%s2933_s1 + $0x8] sm:$0xff] (!%p288_p2)  ;;  %v2226_v20 = vld [vmem:[%s2935_s3 + $0x30] sm:$0xff] (!%p288_p2)  ;;  %vm2655_vm2 = vmmov (!%p288_p2), 0  }
   0x7   : > { %348 = vperm.xlu0 (!%p288_p2), %2643, %v344_v1   ;;  %2644 = vset.pattern.permute.xlu1 (!%p288_p2), %v2653_v2  ;;  %v1982_v4 = vld [vmem:[%s2939_s7] sm:$0x3f] (!%p288_p2)  ;;  %v441_v30 = vld [vmem:[%s2935_s3 + $0x8] sm:$0xff] (!%p288_p2)  ;;  %v2227_v31 = vld [vmem:[%s2935_s3 + $0x38] sm:$0xff] (!%p288_p2) }
   0x8   : > { %v440_v19 = vld [vmem:[%s2935_s3] sm:$0xff] (!%p288_p2)  ;;  %v2208_v32 = vld [vmem:[%s2935_s3 + $0x10] sm:$0xff] (!%p288_p2)  ;;  %v2209_v34 = vld [vmem:[%s2935_s3 + $0x18] sm:$0xff] (!%p288_p2) }
   0x9   : > { %2390 = vmatprep.mubr.msk.f32.mxu1 (!%p288_p2), %vm442_vm1, %v440_v19  ;;  %v2234_v33 = vld [vmem:[%s2935_s3 + $0x40] sm:$0xff] (!%p288_p2)  ;;  %v2235_v35 = vld [vmem:[%s2935_s3 + $0x48] sm:$0xff] (!%p288_p2)  ;;  %v2242_v36 = vld [vmem:[%s2935_s3 + $0x50] sm:$0xff] (!%p288_p2) }
   0xa   : > { %v2243_v37 = vld [vmem:[%s2935_s3 + $0x58] sm:$0xff] (!%p288_p2)  ;;  %v2250_v38 = vld [vmem:[%s2935_s3 + $0x60] sm:$0xff] (!%p288_p2)  ;;  %v2251_v39 = vld [vmem:[%s2935_s3 + $0x68] sm:$0xff] (!%p288_p2) }
   0xb   : > { %353 = vperm.xlu0 (!%p288_p2), %2643, %v345_v3   ;;  %v2258_v40 = vld [vmem:[%s2935_s3 + $0x70] sm:$0xff] (!%p288_p2)  ;;  %v2259_v41 = vld [vmem:[%s2935_s3 + $0x78] sm:$0xff] (!%p288_p2)  ;;  %v524_v45 = vld [vmem:[%s2936_s4] sm:$0xff] (!%p288_p2) }
   0xc   : > { %v2212_v42 = vld [vmem:[%s2936_s4 + $0x10] sm:$0xff] (!%p288_p2)  ;;  %v2213_v43 = vld [vmem:[%s2936_s4 + $0x18] sm:$0xff] (!%p288_p2)  ;;  %v525_v46 = vld [vmem:[%s2936_s4 + $0x8] sm:$0xff] (!%p288_p2) }
   0xd   : > { %s2943_s10 = smov (!%p323_p3, %s2196_s10), 1  ;;  %v2543_v44 = vpack.c.bf16 %v2213_v43, %v2212_v42  ;;  %v2547_v47 = vpack.c.bf16 %v525_v46, %v524_v45  ;;  %v2266_v48 = vld [vmem:[%s2935_s3 + $0x80] sm:$0xff]  ;;  %v2267_v49 = vld [vmem:[%s2935_s3 + $0x88] sm:$0xff]  ;;  %v2230_v59 = vld [vmem:[%s2936_s4 + $0x30] sm:$0xff] }
   0xe   : > { %s2630_s17 = smul.u32 72, %s2943_s10  ;;  %v2222_v54 = vld [vmem:[%s2936_s4 + $0x20] sm:$0xff]  ;;  %v2223_v55 = vld [vmem:[%s2936_s4 + $0x28] sm:$0xff]  ;;  %v2231_v60 = vld [vmem:[%s2936_s4 + $0x38] sm:$0xff]  ;;  %s2278_s16 = sshll.u32 %s2943_s10, 4 }
   0xf   : > { %1985 = vperm.xlu0 %2643, %v1982_v4   ;;  %v2218_v56 = vld [vmem:[%s2935_s3 + $0x20] sm:$0xff]  ;;  %v2555_v57 = vpack.c.bf16 %v2223_v55, %v2222_v54  ;;  %v2219_v58 = vld [vmem:[%s2935_s3 + $0x28] sm:$0xff]  ;;  %v2563_v61 = vpack.c.bf16 %v2231_v60, %v2230_v59  ;;  %v2063_v45 = vld [vmem:[%s2940_s8 + $0x10] sm:$0xff]  ;;  %s332_s19 = scalar_lea.vmem %s2941_s9, %s2278_s16 }
  0x10   : > { %s327_s20 = scalar_lea.vmem %s2932_s0, %s2630_s17  ;;  %v1981_v43 = vld [vmem:[%s2938_s6] sm:$0x3f] }
  0x11   : > { %v333_v5 = vld [vmem:[%s327_s20] sm:$0xff]  ;;  %v334_v6 = vld [vmem:[%s327_s20 + $0x8] sm:$0xff]  ;;  %v335_v7 = vld [vmem:[%s327_s20 + $0x10] sm:$0xff] }
  0x12   : > { %v2519_v8 = vpack.c.bf16 %v334_v6, %v333_v5  ;;  %v336_v9 = vld [vmem:[%s327_s20 + $0x18] sm:$0xff]  ;;  %v337_v11 = vld [vmem:[%s327_s20 + $0x20] sm:$0xff]  ;;  %v338_v12 = vld [vmem:[%s327_s20 + $0x28] sm:$0xff] }
  0x13   : > { %v2523_v10 = vpack.c.bf16 %v336_v9, %v335_v7  ;;  %v2527_v13 = vpack.c.bf16 %v338_v12, %v337_v11  ;;  %v339_v14 = vld [vmem:[%s327_s20 + $0x30] sm:$0xff]  ;;  %v340_v15 = vld [vmem:[%s327_s20 + $0x38] sm:$0xff]  ;;  %v341_v17 = vld [vmem:[%s327_s20 + $0x40] sm:$0xff] }
  0x14   : > { %2520 = vmatprep.subr.bf16.mxu0 %v2519_v8  ;;  %v2531_v16 = vpack.c.bf16 %v340_v15, %v339_v14  ;;  %v1966_v11 = vld [vmem:[%s2937_s5 + $0x8] sm:$0xff]  ;;  %v2238_v12 = vld [vmem:[%s2936_s4 + $0x40] sm:$0xff] }
  0x15   : > { %2522 = vmatpush3.bf16.msra.mxu0 %v2519_v8 }
  0x16   : > { %2524 = vmatprep.subr.bf16.mxu0 %v2523_v10 }
  0x19   : > { %2526 = vmatpush3.bf16.msra.mxu0 %v2523_v10  ;;  %v1965_v10 = vld [vmem:[%s2937_s5] sm:$0xff] }
  0x1a   : > { %2528 = vmatprep.subr.bf16.mxu0 %v2527_v13  ;;  %1969 = vperm.xlu1 %2644, %v1965_v10  }
  0x1d   : > { %2530 = vmatpush3.bf16.msra.mxu0 %v2527_v13  ;;  %v2239_v13 = vld [vmem:[%s2936_s4 + $0x48] sm:$0xff] }
  0x1e   : > { %2532 = vmatprep.subr.bf16.mxu0 %v2531_v16  ;;  %1974 = vperm.xlu1 %2644, %v1966_v11  }
  0x21   : > { %2534 = vmatpush3.bf16.msra.mxu0 %v2531_v16  ;;  %v2571_v16 = vpack.c.bf16 %v2239_v13, %v2238_v12 }
  0x22   : > { %2381 = vmatprep.subr.mxu0 %v341_v17 }
  0x25   : > { %2382 = vmatpush3.msra.mxu0 %v341_v17  ;;  %v2246_v17 = vld [vmem:[%s2936_s4 + $0x50] sm:$0xff] }
  0x26   : > { %2384 = vmatmul.mubr.msk.f32.vlgmr.msra.gmra.mrb[0].mxu0 %vm356_vm0, %v343_v18  ;;  %v2247_v18 = vld [vmem:[%s2936_s4 + $0x58] sm:$0xff] }
  0x27   : > { %2432 = vmatprep.mubr.msk.f32.mxu0 %vm442_vm1, %v2226_v20  ;;  %v2579_v19 = vpack.c.bf16 %v2247_v18, %v2246_v17  ;;  %v2254_v20 = vld [vmem:[%s2936_s4 + $0x60] sm:$0xff] }
  0x86   : > { %v349_v21 = vpop.permute.xlu0 %348 }
  0x8a   : > { %v354_v22 = vpop.permute.xlu0 %353 }
  0xf9   : > { %v2385_v23 = vpop.f32.mrb[0].mxu0 }
  0xfa   : > { %v435_v24 = vadd.f32 %v2385_v23, %v354_v22  ;;  %v429_v25 = vpop.f32.mrb[1].mxu0  ;;  %v2262_v23 = vld [vmem:[%s2936_s4 + $0x70] sm:$0xff] }
  0xfb   : > { %v430_v26 = vadd.f32 %v429_v25, %v349_v21  ;;  %v2255_v21 = vld [vmem:[%s2936_s4 + $0x68] sm:$0xff] }
  0xfc   : > { %v439_v27 = vmax.f32 %v435_v24, 0.0  ;;  %v2587_v22 = vpack.c.bf16 %v2255_v21, %v2254_v20  ;;  %v2263_v24 = vld [vmem:[%s2936_s4 + $0x78] sm:$0xff] }
  0xfd   : > { %v438_v28 = vmax.f32 %v430_v26, 0.0  ;;  %v2595_v25 = vpack.c.bf16 %v2263_v24, %v2262_v23  ;;  %v2270_v26 = vld [vmem:[%s2936_s4 + $0x80] sm:$0xff] }
  0xff   : > { %v2746_v29 = vpack.c.bf16 %v439_v27, %v438_v28  ;;  %v2271_v27 = vld [vmem:[%s2936_s4 + $0x88] sm:$0xff] }
 0x100   : > { %v2603_v28 = vpack.c.bf16 %v2271_v27, %v2270_v26 }
 0x101   : > { %2536 = vmatprep.subr.bf16.mxu1 %v2746_v29  ;;  %2560 = vmatprep.subr.bf16.mxu0 %v2746_v29 }
 0x102   : > { %2538 = vmatpush3.bf16.msra.mxu1 %v2746_v29  ;;  %2562 = vmatpush3.bf16.msra.mxu0 %v2746_v29 }
 0x103   : > { %2540 = vmatprep.subr.bf16.mxu1 %v2746_v29  ;;  %2568 = vmatprep.subr.bf16.mxu0 %v2746_v29 }
 0x105   : > { %2391 = vmatmul.mubr.msk.f32.vlgmr.msra.gmra.mrb[0].mxu1 %vm442_vm1, %v441_v30  ;;  %2433 = vmatmul.mubr.msk.f32.vlgmr.msra.gmra.mrb[2].mxu0 %vm442_vm1, %v2227_v31  ;;  %v2656_v30 = vmov 0.0   ;;  %v1970_v31 = vpop.permute.xlu1 %1969 }
 0x106   : > { %2542 = vmatpush3.bf16.msra.mxu1 %v2746_v29  ;;  %2570 = vmatpush3.bf16.msra.mxu0 %v2746_v29 }
 0x107   : > { %2576 = vmatprep.subr.bf16.mxu0 %v2746_v29  ;;  %2397 = vmatprep.mubr.msk.f32.mxu1 %vm442_vm1, %v2208_v32 }
 0x108   : > { %2446 = vmatprep.mubr.msk.f32.mxu0 %vm442_vm1, %v2234_v33  ;;  %2544 = vmatprep.subr.bf16.mxu1 %v2543_v44 }
 0x109   : > { %2398 = vmatmul.mubr.msk.f32.vlgmr.msra.gmra.mrb[2].mxu1 %vm442_vm1, %v2209_v34  ;;  %2447 = vmatmul.mubr.msk.f32.vlgmr.msra.gmra.mrb[4].mxu0 %vm442_vm1, %v2235_v35  ;;  %v1975_v32 = vpop.permute.xlu1 %1974 }
 0x10a   : > { %2578 = vmatpush3.bf16.msra.mxu0 %v2746_v29  ;;  %2460 = vmatprep.mubr.msk.f32.mxu0 %vm442_vm1, %v2242_v36 }
 0x10b   : > { %2584 = vmatprep.subr.bf16.mxu0 %v2746_v29  ;;  %2546 = vmatpush3.bf16.msra.mxu1 %v2543_v44  ;;  %v2061_v44 = vld [vmem:[%s2940_s8] sm:$0xff] }
 0x10c   : > { %2548 = vmatprep.subr.bf16.mxu1 %v2547_v47  ;;  %v2612_v46 = vpack.c.bf16 %v2063_v45, %v2061_v44 }
 0x10d   : > { %2461 = vmatmul.mubr.msk.f32.vlgmr.msra.gmra.mrb[6].mxu0 %vm442_vm1, %v2243_v37  ;;  %v2062_v37 = vld [vmem:[%s2940_s8 + $0x8] sm:$0xff] }
 0x10e   : > { %2586 = vmatpush3.bf16.msra.mxu0 %v2746_v29  ;;  %2474 = vmatprep.mubr.msk.f32.mxu0 %vm442_vm1, %v2250_v38  ;;  %v2064_v38 = vld [vmem:[%s2940_s8 + $0x18] sm:$0xff] }
 0x10f   : > { %2592 = vmatprep.subr.bf16.mxu0 %v2746_v29 }
 0x111   : > { %2475 = vmatmul.mubr.msk.f32.vlgmr.msra.gmra.mrb[8].mxu0 %vm442_vm1, %v2251_v39 }
 0x112   : > { %2594 = vmatpush3.bf16.msra.mxu0 %v2746_v29  ;;  %2488 = vmatprep.mubr.msk.f32.mxu0 %vm442_vm1, %v2258_v40 }
 0x113   : > { %2600 = vmatprep.subr.bf16.mxu0 %v2746_v29 }
 0x115   : > { %2489 = vmatmul.mubr.msk.f32.vlgmr.msra.gmra.mrb[10].mxu0 %vm442_vm1, %v2259_v41  ;;  %v2610_v41 = vpack.c.bf16 %v2064_v38, %v2062_v37 }
 0x116   : > { %2602 = vmatpush3.bf16.msra.mxu0 %v2746_v29  ;;  %2502 = vmatprep.mubr.msk.f32.mxu0 %vm442_vm1, %v2266_v48 }
 0x119   : > { %2503 = vmatmul.mubr.msk.f32.vlgmr.msra.gmra.mrb[12].mxu0 %vm442_vm1, %v2267_v49 }
 0x11a   : > { %2516 = vmatprep.mubr.msk.f32.mxu0 %vm2655_vm2, %v2656_v30 }
 0x1d8   : > { %v2392_v50 = vpop.f32.mrb[0].mxu1  ;;  %v2434_v62 = vpop.f32.mrb[2].mxu0 }
 0x1d9   : > { %v515_v51 = vpop.f32.mrb[1].mxu1  ;;  %v1020_v63 = vpop.f32.mrb[3].mxu0 }
 0x1dc   : > { %v2399_v52 = vpop.f32.mrb[2].mxu1  ;;  %v2448_v0 = vpop.f32.mrb[4].mxu0 }
 0x1dd   : > { %v601_v53 = vpop.f32.mrb[3].mxu1  ;;  %v1190_v1 = vpop.f32.mrb[5].mxu0 }
 0x1de   : > { %2404 = vmatprep.mubr.msk.f32.mxu1 %vm442_vm1, %v601_v53 }
 0x1df   : > { %2405 = vmatmul.mubr.msk.f32.vlgmr.msra.gmra.mrb[4].mxu1 %vm442_vm1, %v2399_v52 }
 0x1e0   : > { %2550 = vmatpush3.bf16.msra.mxu1 %v2547_v47  ;;  %2411 = vmatprep.mubr.msk.f32.mxu1 %vm442_vm1, %v515_v51  ;;  %v2462_v2 = vpop.f32.mrb[6].mxu0  ;;  %v1986_v47 = vpop.permute.xlu0 %1985 }
 0x1e1   : > { %2552 = vmatprep.subr.bf16.mxu1 %v2746_v29  ;;  %v1360_v3 = vpop.f32.mrb[7].mxu0 }
 0x1e4   : > { %v2476_v4 = vpop.f32.mrb[8].mxu0 }
 0x1e5   : > { %v1530_v5 = vpop.f32.mrb[9].mxu0 }
 0x1e7   : > { %2412 = vmatmul.mubr.msk.f32.vlgmr.msra.gmra.mrb[4].mxu1 %vm442_vm1, %v2392_v50 }
 0x1e8   : > { %2554 = vmatpush3.bf16.msra.mxu1 %v2746_v29  ;;  %2418 = vmatprep.mubr.msk.f32.mxu1 %vm442_vm1, %v2218_v56  ;;  %v2490_v6 = vpop.f32.mrb[10].mxu0  ;;  %v2654_v29 = vmov 0.0|0.0  }
 0x1e9   : > { %2556 = vmatprep.subr.bf16.mxu1 %v2555_v57  ;;  %v1700_v7 = vpop.f32.mrb[11].mxu0  ;;  %2607 = vmatprep.subr.bf16.mxu0 %v2654_v29 }
 0x1eb   : > { %2419 = vmatmul.mubr.msk.f32.vlgmr.msra.gmra.mrb[6].mxu1 %vm442_vm1, %v2219_v58 }
 0x1ec   : > { %2558 = vmatpush3.bf16.msra.mxu1 %v2555_v57  ;;  %v2504_v8 = vpop.f32.mrb[12].mxu0 }
 0x1ed   : > { %2564 = vmatprep.subr.bf16.mxu1 %v2563_v61  ;;  %v1870_v9 = vpop.f32.mrb[13].mxu0 }
 0x2be   : > { %v2420_v14 = vpop.f32.mrb[6].mxu1 }
 0x2bf   : > { %v850_v15 = vpop.f32.mrb[7].mxu1 }
 0x2c0   : > { %2425 = vmatprep.mubr.msk.f32.mxu1 %vm442_vm1, %v850_v15 }
 0x2c1   : > { %2426 = vmatmul.mubr.msk.f32.vlgmr.msra.gmra.mrb[4].mxu1 %vm442_vm1, %v2420_v14 }
 0x2c2   : > { %2566 = vmatpush3.bf16.msra.mxu1 %v2563_v61  ;;  %2439 = vmatprep.mubr.msk.f32.mxu1 %vm442_vm1, %v1020_v63 }
 0x2c3   : > { %2572 = vmatprep.subr.bf16.mxu1 %v2571_v16 }
 0x2c9   : > { %2440 = vmatmul.mubr.msk.f32.vlgmr.msra.gmra.mrb[4].mxu1 %vm442_vm1, %v2434_v62 }
 0x2ca   : > { %2574 = vmatpush3.bf16.msra.mxu1 %v2571_v16  ;;  %2453 = vmatprep.mubr.msk.f32.mxu1 %vm442_vm1, %v1190_v1 }
 0x2cb   : > { %2580 = vmatprep.subr.bf16.mxu1 %v2579_v19 }
 0x2d1   : > { %2454 = vmatmul.mubr.msk.f32.vlgmr.msra.gmra.mrb[4].mxu1 %vm442_vm1, %v2448_v0 }
 0x2d2   : > { %2582 = vmatpush3.bf16.msra.mxu1 %v2579_v19  ;;  %2467 = vmatprep.mubr.msk.f32.mxu1 %vm442_vm1, %v1360_v3 }
 0x2d3   : > { %2588 = vmatprep.subr.bf16.mxu1 %v2587_v22 }
 0x2d9   : > { %2468 = vmatmul.mubr.msk.f32.vlgmr.msra.gmra.mrb[4].mxu1 %vm442_vm1, %v2462_v2 }
 0x2da   : > { %2590 = vmatpush3.bf16.msra.mxu1 %v2587_v22  ;;  %2481 = vmatprep.mubr.msk.f32.mxu1 %vm442_vm1, %v1530_v5 }
 0x2db   : > { %2596 = vmatprep.subr.bf16.mxu1 %v2595_v25 }
 0x2e1   : > { %2482 = vmatmul.mubr.msk.f32.vlgmr.msra.gmra.mrb[4].mxu1 %vm442_vm1, %v2476_v4 }
 0x2e2   : > { %2598 = vmatpush3.bf16.msra.mxu1 %v2595_v25  ;;  %2495 = vmatprep.mubr.msk.f32.mxu1 %vm442_vm1, %v1700_v7 }
 0x2e3   : > { %2604 = vmatprep.subr.bf16.mxu1 %v2603_v28 }
 0x2e9   : > { %2496 = vmatmul.mubr.msk.f32.vlgmr.msra.gmra.mrb[4].mxu1 %vm442_vm1, %v2490_v6 }
 0x2ea   : > { %2606 = vmatpush3.bf16.msra.mxu1 %v2603_v28  ;;  %2509 = vmatprep.mubr.msk.f32.mxu1 %vm442_vm1, %v1870_v9 }
 0x2f1   : > { %2510 = vmatmul.mubr.msk.f32.vlgmr.msra.gmra.mrb[4].mxu1 %vm442_vm1, %v2504_v8 }
 0x3c4   : > { %v2511_v33 = vpop.f32.mrb[4].mxu1 }
 0x3c5   : > { %v1978_v34 = vadd.f32 %v2511_v33, %v1975_v32  ;;  %v1954_v35 = vpop.f32.mrb[5].mxu1 }
 0x3c6   : > { %v1977_v36 = vadd.f32 %v1970_v31, %v1954_v35 }
 0x3c7   : > { %v1980_v39 = vmax.f32 %v1978_v34, 0.0 }
 0x3c8   : > { %v1979_v40 = vmax.f32 %v1977_v36, 0.0 }
 0x3ca   : > { %v2608_v42 = vpack.c.bf16 %v1980_v39, %v1979_v40 }
 0x3cc   : > { %2609 = vmatpush3.bf16.msra.mxu0 %v2608_v42 }
 0x3cd   : > { %2611 = vmatprep.subr.bf16.mxu0 %v2610_v41 }
 0x3cf   : > { %2517 = vmatmul.mubr.msk.f32.vlgmr.msra.gmra.mrb[14].mxu0 %vm442_vm1, %v1981_v43 }
 0x3d0   : > { %2132 = vmatprep.mubr.f32.mxu0 %v2656_v30  ;;  %2613 = vmatpush1.bf16.msra.mxu0 %v2612_v46 }
 0x4a2   : > { %v2057_v48 = vpop.f32.mrb[14].mxu0 }
 0x4a3   : > { %v2058_v49 = vadd.f32 %v2057_v48, %v1986_v47  ;;  %v2518_v50 = vpop.f32.mrb[15].mxu0 }
 0x4a5   : > { %2275 = vmatmul.mubr.msk.f32.vlgmr.msra.gmra.mrb[16].mxu0 %vm442_vm1, %v2058_v49 }
 0x578   : > { %v2134_v51 = vpop.f32.mrb[16].mxu0 }
 0x579   : > { %2139 = vst [vmem:[%s332_s19] sm:$0x3f] %v2134_v51  ;;  %v2136_v52 = vpop.f32.mrb[17].mxu0 }
 0x57a   : > { %2140 = vst [vmem:[%s332_s19 + $0x8] sm:$0x3f] %v2136_v52 }
 0x57b PF: > { %s19_s30 = sadd.s32 1, %s2651_s30  }
 0x57c   : > { %p16_p4 = scmp.ge.s32.totalorder %s19_s30, 4  }
 0x57e   :  { %18 = sbr.rel (!%p16_p4) target bundleno = 1 (0x1), region = 102 }

</bundles_post_ra>
